<compile_context>
chip_gen: v7x
topology: tpu7x:2x2x1
jax: 0.10.0
libtpu: 0.0.40
codegen_flags: <defaults>
</compile_context>

<pallas_src>
import jax
import jax.numpy as jnp
from jax.experimental import pallas as pl
from jax.experimental.pallas import tpu as pltpu


def mlp_kernel(x_ref, w1_ref, b1_ref, w2_ref, b2_ref, w3_ref, b3_ref, o_ref):
    # One (TR, pack*in) packed batch tile.  `pack` batch rows sit side by side in the
    # lane dimension; w1/w2/w3 are block-diagonal so each row group only sees its own
    # weights (off-diagonal blocks are exact zeros -> numerically identical per row).
    x = x_ref[...].astype(jnp.bfloat16)                       # in-kernel VPU cast
    h1 = jnp.dot(x, w1_ref[...], preferred_element_type=jnp.float32) + b1_ref[...]
    h1 = jnp.maximum(h1, 0.0)
    h2 = jnp.dot(h1.astype(jnp.bfloat16), w2_ref[...],
                 preferred_element_type=jnp.float32) + b2_ref[...]
    h2 = jnp.maximum(h2, 0.0)
    y = jnp.dot(h2, w3_ref[...], preferred_element_type=jnp.float32) + b3_ref[...]
    o_ref[...] = y.astype(o_ref.dtype)


def _block_diag(w, pack):
    if pack == 1:
        return w
    fi, fo = w.shape
    out = jnp.zeros((pack * fi, pack * fo), w.dtype)
    for q in range(pack):
        out = out.at[q * fi:(q + 1) * fi, q * fo:(q + 1) * fo].set(w)
    return out


def mlp_forward(x, params, *, tile_batch=16384):
    """Fused MLP forward: streamed packed batch tiles, VMEM-resident weights."""
    w1, b1, w2, b2, w3, b3 = params
    B, in_features = x.shape
    h1_dim, h2_dim = w1.shape[1], w2.shape[1]

    # Row-packing factor: put `pack` batch rows in one 128-lane group whenever the
    # input width divides 128 (the reshape below is then free / contiguous).
    if in_features <= 128 and 128 % in_features == 0:
        pack = 128 // in_features
    else:
        pack = 1

    b_pad = pl.cdiv(B, pack) * pack
    if b_pad != B:                       # tiny (< pack rows) remainder pad only
        x = jnp.pad(x, ((0, b_pad - B), (0, 0)))
    rows = b_pad // pack
    x_packed = x.reshape(rows, pack * in_features)

    # Block-diagonal weights / tiled biases for the packed layout.  bf16 for the two
    # MXU-heavy layers (f32 accumulation in-kernel), f32 for the tiny last layer.
    w1_bd = _block_diag(w1, pack).astype(jnp.bfloat16)
    w2_bd = _block_diag(w2, pack).astype(jnp.bfloat16)
    w3_bd = _block_diag(w3, pack).astype(jnp.float32)
    b1_t = jnp.tile(b1, (1, pack))
    b2_t = jnp.tile(b2, (1, pack))
    b3_t = jnp.tile(b3, (1, pack))

    # Packed-row tile: multiple of 16 (bf16 sublane packing), capped at ~half the
    # batch (>=2 grid steps on large batches for v7x megacore) and at `rows`.
    tile_r = pl.cdiv(max(tile_batch // pack, 16), 16) * 16
    half = pl.cdiv(pl.cdiv(rows, 2), 16) * 16
    tile_r = min(tile_r, half)
    if tile_r >= rows:
        tile_r = rows                    # single full-array block for small inputs
    num_tiles = pl.cdiv(rows, tile_r)

    resident = lambda a: pl.BlockSpec(a.shape, lambda i: (0, 0))

    flops = 2 * b_pad * (in_features * h1_dim + h1_dim * h2_dim + h2_dim)
    bytes_accessed = (b_pad * (in_features * 4 + 4)
                      + (w1_bd.size + w2_bd.size) * 2
                      + (w3_bd.size + b1_t.size + b2_t.size + b3_t.size) * 4)

    out = pl.pallas_call(
        mlp_kernel,
        out_shape=jax.ShapeDtypeStruct((rows, pack), jnp.float32),
        grid_spec=pl.GridSpec(
            grid=(num_tiles,),
            in_specs=[
                pl.BlockSpec((tile_r, pack * in_features), lambda i: (i, 0)),  # x
                resident(w1_bd), resident(b1_t),
                resident(w2_bd), resident(b2_t),
                resident(w3_bd), resident(b3_t),
            ],
            out_specs=pl.BlockSpec((tile_r, pack), lambda i: (i, 0)),
        ),
        compiler_params=pltpu.CompilerParams(
            dimension_semantics=("parallel",),        # megacore sharding on v7x
            vmem_limit_bytes=48 * 1024 * 1024,        # fits v7x's 64 MiB physical VMEM
        ),
        cost_estimate=pl.CostEstimate(
            flops=flops, transcendentals=0, bytes_accessed=bytes_accessed),
    )(x_packed, w1_bd, b1_t, w2_bd, b2_t, w3_bd, b3_t)

    # (rows, pack) row-major == batch order; cheap reshape + slice on a tiny array.
    return out.reshape(b_pad, 1)[:B]


def init_params(key, input_size):
    # Deterministic init mimicking torch.nn.Linear default (uniform +/- 1/sqrt(fan_in)).
    ks = jax.random.split(key, 6)

    def linear(kw, kb, fan_in, fan_out):
        bound = 1.0 / jnp.sqrt(fan_in)
        w = jax.random.uniform(kw, (fan_in, fan_out), jnp.float32, -bound, bound)
        b = jax.random.uniform(kb, (1, fan_out), jnp.float32, -bound, bound)
        return w, b

    w1, b1 = linear(ks[0], ks[1], input_size, 64)
    w2, b2 = linear(ks[2], ks[3], 64, 32)
    w3, b3 = linear(ks[4], ks[5], 32, 1)
    return (w1, b1, w2, b2, w3, b3)


def reference_forward_f32(x, params):
    w1, b1, w2, b2, w3, b3 = params
    h = jnp.maximum(x @ w1 + b1, 0.0)
    h = jnp.maximum(h @ w2 + b2, 0.0)
    return h @ w3 + b3


def reference_forward_bf16(x, params):
    # Same bf16-in / f32-accumulate math as the kernel (final layer stays f32).
    w1, b1, w2, b2, w3, b3 = params
    h = jnp.maximum(
        jnp.dot(x.astype(jnp.bfloat16), w1.astype(jnp.bfloat16),
                preferred_element_type=jnp.float32) + b1, 0.0)
    h = jnp.maximum(
        jnp.dot(h.astype(jnp.bfloat16), w2.astype(jnp.bfloat16),
                preferred_element_type=jnp.float32) + b2, 0.0)
    return h @ w3 + b3


if __name__ == "__main__":
    key = jax.random.PRNGKey(0)
    k_x, k_p, k_x2 = jax.random.split(key, 3)

    input_size = 32
    params = init_params(k_p, input_size)

    # Small demo batch (multiple of the pack factor 128 // 32 = 4).
    x = jax.random.normal(k_x, (32, input_size), jnp.float32)
    out = jax.block_until_ready(mlp_forward(x, params))
    assert out.shape == (32, 1)
    # Tight check vs. cast-matched reference; loose check vs. pure f32 (bf16 inputs
    # are a deliberate precision trade for HBM bandwidth).
    assert jnp.allclose(out, reference_forward_bf16(x, params), atol=1e-3, rtol=1e-3)
    assert jnp.allclose(out, reference_forward_f32(x, params), atol=5e-2, rtol=5e-2)

    # Odd batch: exercises the remainder pad + output slice path.
    x2 = jax.random.normal(k_x2, (37, input_size), jnp.float32)
    out2 = jax.block_until_ready(mlp_forward(x2, params))
    assert out2.shape == (37, 1)
    assert jnp.allclose(out2, reference_forward_bf16(x2, params), atol=1e-3, rtol=1e-3)
    assert jnp.allclose(out2, reference_forward_f32(x2, params), atol=5e-2, rtol=5e-2)

    print("KERNEL_OK")
</pallas_src>

<mosaic_0001>
module attributes {stable_mosaic.version = 11 : i64} {
  func.func @mlp_kernel(%arg0: i32, %arg1: memref<8x128xf32, #tpu.memory_space<vmem>>, %arg2: memref<128x256xbf16, #tpu.memory_space<vmem>>, %arg3: memref<1x256xf32, #tpu.memory_space<vmem>>, %arg4: memref<256x128xbf16, #tpu.memory_space<vmem>>, %arg5: memref<1x128xf32, #tpu.memory_space<vmem>>, %arg6: memref<128x4xf32, #tpu.memory_space<vmem>>, %arg7: memref<1x4xf32, #tpu.memory_space<vmem>>, %arg8: memref<8x4xf32, #tpu.memory_space<vmem>>) attributes {dimension_semantics = [#tpu.dimension_semantics<parallel>], iteration_bounds = array<i64: 1>, scalar_prefetch = 0 : i64, scratch_operands = 0 : i64, tpu.core_type = #tpu.core_type<tc>, window_params = [{transform_indices = @transform_0, window_bounds = array<i64: 8, 128>}, {pipeline_mode = #tpu.pipeline_mode<synchronous>, transform_indices = @transform_1, window_bounds = array<i64: 128, 256>}, {pipeline_mode = #tpu.pipeline_mode<synchronous>, transform_indices = @transform_2, window_bounds = array<i64: 1, 256>}, {pipeline_mode = #tpu.pipeline_mode<synchronous>, transform_indices = @transform_3, window_bounds = array<i64: 256, 128>}, {pipeline_mode = #tpu.pipeline_mode<synchronous>, transform_indices = @transform_4, window_bounds = array<i64: 1, 128>}, {pipeline_mode = #tpu.pipeline_mode<synchronous>, transform_indices = @transform_5, window_bounds = array<i64: 128, 4>}, {pipeline_mode = #tpu.pipeline_mode<synchronous>, transform_indices = @transform_6, window_bounds = array<i64: 1, 4>}, {transform_indices = @transform_7, window_bounds = array<i64: 8, 4>}]} {
    %c0 = arith.constant 0 : index
    %c0_0 = arith.constant 0 : index
    %0 = vector.load %arg1[%c0, %c0_0] : memref<8x128xf32, #tpu.memory_space<vmem>>, vector<8x128xf32>
    %1 = arith.truncf %0 : vector<8x128xf32> to vector<8x128xbf16>
    %c0_1 = arith.constant 0 : index
    %c0_2 = arith.constant 0 : index
    %2 = vector.load %arg2[%c0_1, %c0_2] : memref<128x256xbf16, #tpu.memory_space<vmem>>, vector<128x256xbf16>
    %cst = arith.constant dense<0.000000e+00> : vector<8x256xf32>
    %3 = tpu.matmul %1, %2, %cst {dimension_numbers = #tpu.dot_dimension_numbers<[1], [0], [0], [1], [0, 0, 1, 1], [], []>} : vector<8x128xbf16>, vector<128x256xbf16>, vector<8x256xf32> -> vector<8x256xf32>
    %c0_3 = arith.constant 0 : index
    %c0_4 = arith.constant 0 : index
    %4 = vector.load %arg3[%c0_3, %c0_4] : memref<1x256xf32, #tpu.memory_space<vmem>>, vector<1x256xf32>
    %5 = vector.broadcast %4 : vector<1x256xf32> to vector<8x256xf32>
    %6 = arith.addf %3, %5 : vector<8x256xf32>
    %cst_5 = arith.constant 0.000000e+00 : f32
    %7 = vector.broadcast %cst_5 : f32 to vector<8x256xf32>
    %8 = arith.maximumf %6, %7 : vector<8x256xf32>
    %9 = arith.truncf %8 : vector<8x256xf32> to vector<8x256xbf16>
    %c0_6 = arith.constant 0 : index
    %c0_7 = arith.constant 0 : index
    %10 = vector.load %arg4[%c0_6, %c0_7] : memref<256x128xbf16, #tpu.memory_space<vmem>>, vector<256x128xbf16>
    %cst_8 = arith.constant dense<0.000000e+00> : vector<8x128xf32>
    %11 = tpu.matmul %9, %10, %cst_8 {dimension_numbers = #tpu.dot_dimension_numbers<[1], [0], [0], [1], [0, 0, 1, 1], [], []>} : vector<8x256xbf16>, vector<256x128xbf16>, vector<8x128xf32> -> vector<8x128xf32>
    %c0_9 = arith.constant 0 : index
    %c0_10 = arith.constant 0 : index
    %12 = vector.load %arg5[%c0_9, %c0_10] : memref<1x128xf32, #tpu.memory_space<vmem>>, vector<1x128xf32>
    %13 = vector.broadcast %12 : vector<1x128xf32> to vector<8x128xf32>
    %14 = arith.addf %11, %13 : vector<8x128xf32>
    %cst_11 = arith.constant 0.000000e+00 : f32
    %15 = vector.broadcast %cst_11 : f32 to vector<8x128xf32>
    %16 = arith.maximumf %14, %15 : vector<8x128xf32>
    %c0_12 = arith.constant 0 : index
    %c0_13 = arith.constant 0 : index
    %17 = vector.load %arg6[%c0_12, %c0_13] : memref<128x4xf32, #tpu.memory_space<vmem>>, vector<128x4xf32>
    %cst_14 = arith.constant dense<0.000000e+00> : vector<8x4xf32>
    %18 = tpu.matmul %16, %17, %cst_14 {dimension_numbers = #tpu.dot_dimension_numbers<[1], [0], [0], [1], [0, 0, 1, 1], [], []>} : vector<8x128xf32>, vector<128x4xf32>, vector<8x4xf32> -> vector<8x4xf32>
    %c0_15 = arith.constant 0 : index
    %c0_16 = arith.constant 0 : index
    %19 = vector.load %arg7[%c0_15, %c0_16] : memref<1x4xf32, #tpu.memory_space<vmem>>, vector<1x4xf32>
    %20 = vector.broadcast %19 : vector<1x4xf32> to vector<8x4xf32>
    %21 = arith.addf %18, %20 : vector<8x4xf32>
    %c0_17 = arith.constant 0 : index
    %c0_18 = arith.constant 0 : index
    %22 = vector.load %arg8[%c0_17, %c0_18] : memref<8x4xf32, #tpu.memory_space<vmem>>, vector<8x4xf32>
    tpu.vector_store %arg8[%c0_17, %c0_18], %21 {strides = array<i32>} : memref<8x4xf32, #tpu.memory_space<vmem>>, vector<8x4xf32>,
    return
  }
  func.func @transform_0(%arg0: i32) -> (i32, i32) {
    %c0_i32 = arith.constant 0 : i32
    %c0_i32_0 = arith.constant 0 : i32
    return %arg0, %c0_i32 : i32, i32
  }
  func.func @transform_1(%arg0: i32) -> (i32, i32) {
    %c0_i32 = arith.constant 0 : i32
    %c0_i32_0 = arith.constant 0 : i32
    %c0_i32_1 = arith.constant 0 : i32
    return %c0_i32, %c0_i32_0 : i32, i32
  }
  func.func @transform_2(%arg0: i32) -> (i32, i32) {
    %c0_i32 = arith.constant 0 : i32
    %c0_i32_0 = arith.constant 0 : i32
    %c0_i32_1 = arith.constant 0 : i32
    return %c0_i32, %c0_i32_0 : i32, i32
  }
  func.func @transform_3(%arg0: i32) -> (i32, i32) {
    %c0_i32 = arith.constant 0 : i32
    %c0_i32_0 = arith.constant 0 : i32
    %c0_i32_1 = arith.constant 0 : i32
    return %c0_i32, %c0_i32_0 : i32, i32
  }
  func.func @transform_4(%arg0: i32) -> (i32, i32) {
    %c0_i32 = arith.constant 0 : i32
    %c0_i32_0 = arith.constant 0 : i32
    %c0_i32_1 = arith.constant 0 : i32
    return %c0_i32, %c0_i32_0 : i32, i32
  }
  func.func @transform_5(%arg0: i32) -> (i32, i32) {
    %c0_i32 = arith.constant 0 : i32
    %c0_i32_0 = arith.constant 0 : i32
    %c0_i32_1 = arith.constant 0 : i32
    return %c0_i32, %c0_i32_0 : i32, i32
  }
  func.func @transform_6(%arg0: i32) -> (i32, i32) {
    %c0_i32 = arith.constant 0 : i32
    %c0_i32_0 = arith.constant 0 : i32
    %c0_i32_1 = arith.constant 0 : i32
    return %c0_i32, %c0_i32_0 : i32, i32
  }
  func.func @transform_7(%arg0: i32) -> (i32, i32) {
    %c0_i32 = arith.constant 0 : i32
    %c0_i32_0 = arith.constant 0 : i32
    return %arg0, %c0_i32 : i32, i32
  }
}

</mosaic_0001>

<bundles_post_ra>
// kernel: tpu_custom_call.1
= control target key start
LH: loop header
LB: loop body
LE: loop exit
PB: predicated region body
PF: predicated region fallthrough
CT: control target
= control target key end

     0   :  { %12 = vsyncpa [#allocation3], 0  ;;  %s900_s0 = inlined_call_operand.hbm [shape: f32[8,128], index: 0, kind: input, shape index: {}]   ;;  %s901_s1 = inlined_call_operand.vmem [shape: bf16[128,256], index: 1, kind: input, shape index: {}]   ;;  %s902_s2 = inlined_call_operand.vmem [shape: f32[1,256], index: 2, kind: input, shape index: {}]   ;;  %s903_s3 = inlined_call_operand.hbm [shape: bf16[256,128], index: 3, kind: input, shape index: {}]   ;;  %s904_s4 = inlined_call_operand.vmem [shape: f32[1,128], index: 4, kind: input, shape index: {}]   ;;  %s905_s5 = inlined_call_operand.vmem [shape: f32[128,4], index: 5, kind: input, shape index: {}]   ;;  %s906_s6 = inlined_call_operand.vmem [shape: f32[1,4], index: 6, kind: input, shape index: {}]   ;;  %s907_s7 = inlined_call_operand.vmem [shape: f32[8,4], index: 7, kind: output, shape index: {}]  }
   0x1   :  { %13 = vsyncpa [#allocation5], 0  ;;  %s713_s24 = smov [#allocation2]   ;;  %s714_s26 = smov [#allocation4]  }
   0x2   :  { %s20_s25 = sshll.u32 %s713_s24, 4  ;;  %s33_s27 = sshll.u32 %s714_s26, 4  ;;  %s21_s25 = int_to_ptr.vmem [resolvable:$true] %s20_s25  ;;  %s761_s27 = int_to_ptr.vmem [resolvable:$true] %s33_s27 }
   0x3   :  { %s665_s30 = scalar_lea.hbm %s900_s0, 128 }
   0x4   :  { %p666_p0 = scmp.ne.s32.totalorder %s900_s0, %s665_s30  ;;  %p669_p1 = scmp.lt.u32.totalorder %s665_s30, %s900_s0 }
   0x6   :  { %p671_p2 = pnand %p669_p1, %p666_p0 }
   0x8   :  { %674 = shalt.err (!%p671_p2)
}
   0x9   :  { %s675_s12 = scalar_lea.vmem %s21_s25, 128  ;;  %p680_p4 = scmp.lt.s32.totalorder %s21_s25, %s21_s25 }
   0xa   :  { %p676_p3 = scmp.ne.s32.totalorder %s21_s25, %s675_s12  ;;  %p681_p5 = scmp.lt.s32.totalorder %s675_s12, %s675_s12 }
   0xc   :  { %p682_p6 = por %p681_p5, %p680_p4 }
   0xe   :  { %p683_p7 = pnand %p682_p6, %p676_p3 }
  0x10   :  { %686 = shalt.err (!%p683_p7)
}
  0x11   :  { %23 = dma.hbm_to_vmem [thread:$0]  %s900_s0, 128, %s21_s25, [#allocation3]  }
  0x12   :  { %s687_s17 = scalar_lea.hbm %s903_s3, 2048 }
  0x13   :  { %p688_p8 = scmp.ne.s32.totalorder %s903_s3, %s687_s17  ;;  %p691_p9 = scmp.lt.u32.totalorder %s687_s17, %s903_s3 }
  0x15   :  { %p693_p10 = pnand %p691_p9, %p688_p8 }
  0x17   :  { %696 = shalt.err (!%p693_p10)
}
  0x18   :  { %s697_s22 = scalar_lea.vmem %s761_s27, 2048  ;;  %p702_p12 = scmp.lt.s32.totalorder %s761_s27, %s761_s27 }
  0x19   :  { %p698_p11 = scmp.ne.s32.totalorder %s761_s27, %s697_s22  ;;  %p703_p13 = scmp.lt.s32.totalorder %s697_s22, %s697_s22 }
  0x1b   :  { %p704_p0 = por %p703_p13, %p702_p12 }
  0x1d   :  { %p705_p1 = pnand %p704_p0, %p698_p11 }
  0x1f   :  { %708 = shalt.err (!%p705_p1)
}
  0x20   :  { %s715_s0 = smov 64   ;;  %s716_s23 = smov 4  }
  0x21   :  { %39 = dma.hbm_to_vmem [thread:$0]  %s903_s3, 2048, %s761_s27, [#allocation5], %s715_s0, %s715_s0, %s716_s23  }
  0x22   :  { %709 = dma.done.wait [#allocation3], 128  }
  0x23   :  { %710 = vsyncadd [#allocation3], 4294967168 }
  0x24   :  { %711 = dma.done.wait [#allocation5], 2048  }
  0x25   :  { %712 = vsyncadd [#allocation5], 4294965248  ;;  %v717_v0 = vmov 0   ;;  %v625_v1 = vld [vmem:[%s901_s1 + $0x4] ss:$8 sps:$4 sm:$0xff]   ;;  %v651_v13 = vld [vmem:[#allocation4 + $0x48] sm:$0xff]   ;;  %v73_v54 = vlaneseq }
  0x26   :  { %195 = vmatprep.mubr.bf16.mxu0 %v717_v0  ;;  %v627_v2 = vld [vmem:[%s901_s1] ss:$8 sps:$4 sm:$0xff]   ;;  %163 = vmatprep.subr.bf16.mxu0 %v625_v1  ;;  %v628_v3 = vld [vmem:[%s901_s1 + $0x14] ss:$8 sps:$4 sm:$0xff]   ;;  %v630_v4 = vld [vmem:[%s901_s1 + $0x10] ss:$8 sps:$4 sm:$0xff]  }
  0x27   :  { %164 = vmatpush1.bf16.msra.mxu0 %v627_v2  ;;  %v631_v5 = vld [vmem:[%s901_s1 + $0x24] ss:$8 sps:$4 sm:$0xff]   ;;  %v633_v6 = vld [vmem:[%s901_s1 + $0x20] ss:$8 sps:$4 sm:$0xff]   ;;  %v634_v7 = vld [vmem:[%s901_s1 + $0x34] ss:$8 sps:$4 sm:$0xff]  }
  0x28   :  { %165 = vmatprep.subr.bf16.mxu0 %v628_v3  ;;  %v636_v8 = vld [vmem:[%s901_s1 + $0x30] ss:$8 sps:$4 sm:$0xff]   ;;  %v637_v9 = vld [vmem:[%s901_s1 + $0x44] ss:$8 sps:$4 sm:$0xff]   ;;  %v639_v12 = vld [vmem:[%s901_s1 + $0x40] ss:$8 sps:$4 sm:$0xff]  }
  0x29   :  { %v649_v10 = vld [vmem:[#allocation4 + $0x40] sm:$0xff]   ;;  %v652_v14 = vld [vmem:[#allocation4 + $0x8] sm:$0xff]   ;;  %v653_v15 = vld [vmem:[#allocation4 + $0x50] sm:$0xff]   ;;  %v718_v38 = vmov 0.0|0.0   ;;  %v74_v55 = vshrl.u32 %v73_v54, 7  ;;  %vm719_vm0 = vmmov 0  }
  0x2a   :  { %v650_v11 = vld [vmem:[#allocation4] sm:$0xff]   ;;  %519 = vmatprep.subr.bf16.mxu1 %v649_v10  ;;  %v640_v16 = vld [vmem:[%s901_s1 + $0x54] ss:$8 sps:$4 sm:$0xff]   ;;  %v642_v17 = vld [vmem:[%s901_s1 + $0x50] ss:$8 sps:$4 sm:$0xff]   ;;  %vm477_vm1 = vcmask 31744  }
  0x2b   :  { %166 = vmatpush1.bf16.msra.mxu0 %v630_v4  ;;  %520 = vmatpush3.bf16.msra.mxu1 %v650_v11  ;;  %v654_v18 = vld [vmem:[#allocation4 + $0x10] sm:$0xff]   ;;  %v655_v19 = vld [vmem:[#allocation4 + $0x58] sm:$0xff]   ;;  %v657_v24 = vld [vmem:[#allocation4 + $0x60] sm:$0xff]   ;;  %v75_v56 = vsub.s32 0, %v74_v55  ;;  %v79_v58 = vsub.s32 1, %v74_v55 }
  0x2c   :  { %167 = vmatprep.subr.bf16.mxu0 %v631_v5  ;;  %521 = vmatprep.subr.bf16.mxu1 %v651_v13  ;;  %v643_v20 = vld [vmem:[%s901_s1 + $0x64] ss:$8 sps:$4 sm:$0xff]   ;;  %v645_v21 = vld [vmem:[%s901_s1 + $0x60] ss:$8 sps:$4 sm:$0xff]   ;;  %v646_v22 = vld [vmem:[%s901_s1 + $0x74] ss:$8 sps:$4 sm:$0xff]  }
  0x2d   :  { %v656_v23 = vld [vmem:[#allocation4 + $0x18] sm:$0xff]   ;;  %v658_v25 = vld [vmem:[#allocation4 + $0x20] sm:$0xff]   ;;  %v648_v26 = vld [vmem:[%s901_s1 + $0x70] ss:$8 sps:$4 sm:$0xff]   ;;  %v720_v13 = vmov 0.0  }
  0x2e   :  { %v53_v27 = vld [vmem:[#allocation2] sm:$0xff]  ;;  %v659_v28 = vld [vmem:[#allocation4 + $0x68] sm:$0xff]   ;;  %v661_v31 = vld [vmem:[#allocation4 + $0x70] sm:$0xff]  }
  0x2f   :  { %168 = vmatpush1.bf16.msra.mxu0 %v633_v6  ;;  %522 = vmatpush3.bf16.msra.mxu1 %v652_v14  ;;  %v54_v29 = vpack.c.bf16 %v53_v27, %v53_v27  ;;  %v660_v30 = vld [vmem:[#allocation4 + $0x28] sm:$0xff]   ;;  %v662_v32 = vld [vmem:[#allocation4 + $0x30] sm:$0xff]   ;;  %v663_v33 = vld [vmem:[#allocation4 + $0x78] sm:$0xff]  }
  0x30   :  { %169 = vmatprep.subr.bf16.mxu0 %v634_v7  ;;  %523 = vmatprep.subr.bf16.mxu1 %v653_v15  ;;  %v664_v34 = vld [vmem:[#allocation4 + $0x38] sm:$0xff]   ;;  %v385_v36 = vld [vmem:[%s905_s5 + $0x8] sm:$0xff]  ;;  %v386_v37 = vld [vmem:[%s905_s5 + $0x10] sm:$0xff] }
  0x31   :  { %v384_v35 = vld [vmem:[%s905_s5] sm:$0xff]  ;;  %v387_v40 = vld [vmem:[%s905_s5 + $0x18] sm:$0xff]  ;;  %v389_v43 = vld [vmem:[%s905_s5 + $0x28] sm:$0xff] }
  0x32   :  { %v594_v39 = vpack.c.bf16 %v385_v36, %v384_v35  ;;  %v597_v41 = vpack.c.bf16 %v387_v40, %v386_v37  ;;  %v388_v42 = vld [vmem:[%s905_s5 + $0x20] sm:$0xff]  ;;  %v390_v45 = vld [vmem:[%s905_s5 + $0x30] sm:$0xff]  ;;  %v391_v46 = vld [vmem:[%s905_s5 + $0x38] sm:$0xff] }
  0x33   :  { %170 = vmatpush1.bf16.msra.mxu0 %v636_v8  ;;  %524 = vmatpush3.bf16.msra.mxu1 %v654_v18  ;;  %v600_v44 = vpack.c.bf16 %v389_v43, %v388_v42  ;;  %v603_v47 = vpack.c.bf16 %v391_v46, %v390_v45  ;;  %v392_v48 = vld [vmem:[%s905_s5 + $0x40] sm:$0xff]  ;;  %v393_v49 = vld [vmem:[%s905_s5 + $0x48] sm:$0xff]  ;;  %v394_v51 = vld [vmem:[%s905_s5 + $0x50] sm:$0xff] }
  0x34   :  { %171 = vmatprep.subr.bf16.mxu0 %v637_v9  ;;  %525 = vmatprep.subr.bf16.mxu1 %v655_v19  ;;  %v606_v50 = vpack.c.bf16 %v393_v49, %v392_v48  ;;  %v395_v52 = vld [vmem:[%s905_s5 + $0x58] sm:$0xff]  ;;  %v71_v57 = vld [vmem:[%s902_s2] sm:$0x3]  ;;  %v397_v8 = vld [vmem:[%s905_s5 + $0x68] sm:$0xff] }
  0x35   :  { %v609_v53 = vpack.c.bf16 %v395_v52, %v394_v51  ;;  %v76_v59 = vrot.slane %v71_v57, %v75_v56  ;;  %v80_v60 = vrot.slane %v71_v57, %v79_v58  ;;  %v396_v7 = vld [vmem:[%s905_s5 + $0x60] sm:$0xff]  ;;  %v398_v10 = vld [vmem:[%s905_s5 + $0x70] sm:$0xff]  ;;  %v399_v11 = vld [vmem:[%s905_s5 + $0x78] sm:$0xff] }
  0x36   :  { %v612_v9 = vpack.c.bf16 %v397_v8, %v396_v7  ;;  %v501_v15 = vld [vmem:[%s904_s4] ss:$0 sm:$0xff] }
  0x37   :  { %172 = vmatpush1.bf16.msra.mxu0 %v639_v12  ;;  %526 = vmatpush3.bf16.msra.mxu1 %v656_v23  ;;  %v615_v12 = vpack.c.bf16 %v399_v11, %v398_v10 }
  0x38   :  { %173 = vmatprep.subr.bf16.mxu0 %v640_v16  ;;  %527 = vmatprep.subr.bf16.mxu1 %v657_v24 }
  0x3b   :  { %174 = vmatpush1.bf16.msra.mxu0 %v642_v17  ;;  %528 = vmatpush3.bf16.msra.mxu1 %v658_v25 }
  0x3c   :  { %175 = vmatprep.subr.bf16.mxu0 %v643_v20  ;;  %529 = vmatprep.subr.bf16.mxu1 %v659_v28 }
  0x3f   :  { %176 = vmatpush1.bf16.msra.mxu0 %v645_v21  ;;  %530 = vmatpush3.bf16.msra.mxu1 %v660_v30 }
  0x40   :  { %177 = vmatprep.subr.bf16.mxu0 %v646_v22  ;;  %531 = vmatprep.subr.bf16.mxu1 %v661_v31  ;;  %v518_v22 = vld [vmem:[%s906_s6] ss:$0 sm:$0xff] }
  0x43   :  { %178 = vmatpush1.bf16.msra.mxu0 %v648_v26  ;;  %532 = vmatpush3.bf16.msra.mxu1 %v662_v32 }
  0x44   :  { %533 = vmatprep.subr.bf16.mxu1 %v663_v33  ;;  %593 = vmatprep.subr.bf16.mxu0 %v718_v38 }
  0x46   :  { %196 = vmatmul.mubr.bf16.vlgmr.msra.gmra.mrb[0].mxu0 %v54_v29 }
  0x47   :  { %534 = vmatpush3.bf16.msra.mxu1 %v664_v34  ;;  %595 = vmatpush3.bf16.msra.mxu0 %v594_v39 }
  0x48   :  { %596 = vmatprep.subr.bf16.mxu0 %v718_v38  ;;  %590 = vmatprep.mubr.msk.f32.mxu0 %vm719_vm0, %v720_v13 }
  0x4b   :  { %598 = vmatpush3.bf16.msra.mxu0 %v597_v41 }
  0x4c   :  { %599 = vmatprep.subr.bf16.mxu0 %v718_v38 }
  0x4f   :  { %601 = vmatpush3.bf16.msra.mxu0 %v600_v44 }
  0x50   :  { %602 = vmatprep.subr.bf16.mxu0 %v718_v38 }
  0x53   :  { %604 = vmatpush3.bf16.msra.mxu0 %v603_v47 }
  0x54   :  { %605 = vmatprep.subr.bf16.mxu0 %v718_v38 }
  0x57   :  { %607 = vmatpush3.bf16.msra.mxu0 %v606_v50 }
  0x58   :  { %608 = vmatprep.subr.bf16.mxu0 %v718_v38 }
  0x5b   :  { %610 = vmatpush3.bf16.msra.mxu0 %v609_v53 }
  0x5c   :  { %611 = vmatprep.subr.bf16.mxu0 %v718_v38 }
  0x5f   :  { %613 = vmatpush3.bf16.msra.mxu0 %v612_v9 }
  0x60   :  { %614 = vmatprep.subr.bf16.mxu0 %v718_v38 }
  0x63   :  { %616 = vmatpush3.bf16.msra.mxu0 %v615_v12 }
 0x119   :  { %v197_v61 = vpop.f32.mrb[0].mxu0 }
 0x11a   :  { %v198_v62 = vadd.f32 %v197_v61, %v76_v59  ;;  %v199_v63 = vpop.f32.mrb[1].mxu0 }
 0x11b   :  { %v200_v0 = vadd.f32 %v199_v63, %v80_v60  ;;  %v201_v1 = vpop.f32.mrb[2].mxu0 }
 0x11c   :  { %v204_v2 = vmax.f32 %v198_v62, 0.0  ;;  %v202_v3 = vpop.f32.mrb[3].mxu0 }
 0x11d   :  { %v205_v4 = vmax.f32 %v200_v0, 0.0 }
 0x11e   :  { %v206_v6 = vpack.c.bf16 %v204_v2, %v204_v2 }
 0x11f   :  { %v207_v5 = vpack.c.bf16 %v205_v4, %v205_v4 }
 0x121   :  { %375 = vmatprep.mubr.bf16.mxu1 %v207_v5 }
 0x122   :  { %376 = vmatmul.mubr.bf16.vlgmr.msra.gmra.mrb[0].mxu1 %v206_v6 }
 0x1f5   :  { %v535_v14 = vpop.f32.mrb[0].mxu1 }
 0x1f6   :  { %v536_v16 = vpop.f32.mrb[1].mxu1 }
 0x1f7   :  { %v537_v17 = vadd.f32 %v536_v16, %v535_v14  ;;  %v538_v18 = vpop.f32.mrb[2].mxu1 }
 0x1f8   :  { %v539_v19 = vpop.f32.mrb[3].mxu1 }
 0x1f9   :  { %v378_v20 = vadd.f32 %v537_v17, %v501_v15 }
 0x1fb   :  { %v383_v21 = vmax.f32 %v378_v20, 0.0 }
 0x1fd   :  { %591 = vmatmul.mubr.f32.vlgmr.msra.gmra.mrb[4].mxu0 %v383_v21 }
 0x2d0   :  { %v473_v23 = vpop.f32.mrb[4].mxu0 }
 0x2d1   :  { %v474_v24 = vadd.f32 %v518_v22, %v473_v23  ;;  %v592_v25 = vpop.f32.mrb[5].mxu0 }
 0x2d3   :  { %478 = vst.msk [vmem:[%s907_s7] sm:$0xff] %vm477_vm1, %v474_v24 }
 0x2d4   :  { %483 = vsyncpa [#allocation3], 1 }
 0x2d5   :  { %484 = vsyncpa [#allocation5], 1 }

</bundles_post_ra>
